<compile_context>
chip_gen: v7x
topology: tpu7x:2x2x1
jax: 0.10.0
libtpu: 0.0.40
codegen_flags: <defaults>
</compile_context>

<pallas_src>
import jax
import jax.numpy as jnp
from jax.experimental import pallas as pl
from jax.experimental.pallas import tpu as pltpu

# ---- packed parameter layout (offsets into the 1-D SMEM param vector) ------
HID = 5
W1, B1 = 0, 5                      # w1: [1,5] -> 5 scalars, b1: 5
W2, B2 = 10, 35                    # w2: [5,5] row-major [in,out] -> 25, b2: 5
W3, B3 = 40, 65                    # w3: [5,5] -> 25, b3: 5
W4, B4 = 70, 75                    # w4: [5,1] -> 5, b4: 1
R, XBAR, XINI = 76, 77, 78
NPARAMS = 79

LANES = 128


def _make_net_kernel(chunk, n_chunks, hidden_dtype):
    """Kernel factory: strip-mines the (br, 128) tile into `n_chunks` sub-slabs
    of `chunk` rows each, keeping the whole per-chunk chain in vregs."""
    hid_is_f32 = jnp.dtype(hidden_dtype) == jnp.dtype(jnp.float32)

    def kernel(p_ref,              # SMEM: [NPARAMS] f32 packed params
               t_ref,              # VMEM: [br, 128] f32, batch on lanes
               o_ref):             # VMEM: [br, 128] f32
        # ---- hoist every SMEM scalar read out of the strip-mine loop -------
        w1 = [p_ref[W1 + j] for j in range(HID)]
        b1 = [p_ref[B1 + j] for j in range(HID)]
        w2 = [[p_ref[W2 + k * HID + j] for j in range(HID)] for k in range(HID)]
        b2 = [p_ref[B2 + j] for j in range(HID)]
        w3 = [[p_ref[W3 + k * HID + j] for j in range(HID)] for k in range(HID)]
        b3 = [p_ref[B3 + j] for j in range(HID)]
        w4 = [p_ref[W4 + k] for k in range(HID)]

        # Folded constants (2 fewer VALU ops / element, computed once per tile):
        #   out = sum_k h[k]*w4[k] + (b4 + x_bar) + (x_ini - x_bar)*exp(-r*t)
        b4_plus_xbar = p_ref[B4] + p_ref[XBAR]
        neg_r = -p_ref[R]
        delta = p_ref[XINI] - p_ref[XBAR]

        if hid_is_f32:
            hw1, hb1, hw2, hb2, hw3, hb3 = w1, b1, w2, b2, w3, b3
        else:
            # Optional v6e/v7x bf16 hidden path (do NOT use on v5e).
            cast = lambda s: s.astype(hidden_dtype)
            hw1 = [cast(s) for s in w1]
            hb1 = [cast(s) for s in b1]
            hw2 = [[cast(s) for s in row] for row in w2]
            hb2 = [cast(s) for s in b2]
            hw3 = [[cast(s) for s in row] for row in w3]
            hb3 = [cast(s) for s in b3]

        def dense_tanh(h_in, w, b):
            # 5 -> 5 layer: 25 broadcast FMAs on the VPU + 5 tanh on the EUP.
            out = []
            for j in range(HID):
                acc = h_in[0] * w[0][j]
                for k in range(1, HID):
                    acc = acc + h_in[k] * w[k][j]
                out.append(jnp.tanh(acc + b[j]))
            return out

        @pl.loop(0, n_chunks)
        def _(c):
            row0 = pl.multiple_of(c * chunk, chunk)
            t = t_ref[pl.ds(row0, chunk), :]            # (chunk, 128) f32
            th = t if hid_is_f32 else t.astype(hidden_dtype)

            # Layer 1 (1 -> 5): per-unit scalar scale + shift, then tanh.
            h = [jnp.tanh(hw1[j] * th + hb1[j]) for j in range(HID)]
            # Layers 2 and 3 (5 -> 5).
            h = dense_tanh(h, hw2, hb2)
            h = dense_tanh(h, hw3, hb3)

            # Output layer (5 -> 1), accumulated in f32.
            out1 = h[0].astype(jnp.float32) * w4[0]
            for k in range(1, HID):
                out1 = out1 + h[k].astype(jnp.float32) * w4[k]

            # Analytic term (f32): delta * exp(-r * t); bias folded in below.
            out2 = delta * jnp.exp(neg_r * t)

            o_ref[pl.ds(row0, chunk), :] = out1 + out2 + b4_plus_xbar

    return kernel


def pack_params(p):
    """Flatten all weights/biases/scalars into one f32 vector (SMEM payload)."""
    parts = [
        p["w1"].reshape(-1),               # 5   ([1,5], w1[0,j])
        p["b1"].reshape(-1),               # 5
        p["w2"].reshape(-1),               # 25  ([in,out] row-major)
        p["b2"].reshape(-1),               # 5
        p["w3"].reshape(-1),               # 25
        p["b3"].reshape(-1),               # 5
        p["w4"].reshape(-1),               # 5   ([5,1], w4[k,0])
        p["b4"].reshape(-1),               # 1
        jnp.reshape(p["r"], (1,)),
        jnp.reshape(p["x_bar"], (1,)),
        jnp.reshape(p["x_ini"], (1,)),
    ]
    packed = jnp.concatenate(parts).astype(jnp.float32)
    assert packed.shape == (NPARAMS,)
    return packed


def net_forward(t, params, *, block_rows=1024, hidden_dtype=jnp.float32):
    """t: [N, 1] float32 -> [N, 1] float32 (matches the PyTorch forward)."""
    N = t.shape[0]
    packed = pack_params(params)

    rows = pl.cdiv(N, LANES)

    # Grid-step count: >= 2 whenever there is more than one vreg-row of work so
    # v7x's two TensorCores both get tiles on the "parallel" axis.
    nb = pl.cdiv(rows, block_rows)
    if rows > 8:
        nb = max(nb, 2)
    per = pl.cdiv(rows, nb)
    align = 32 if per > 8 else 8          # keep br a multiple of the 32-row chunk
    br = ((per + align - 1) // align) * align
    rows_padded = nb * br
    padded_n = rows_padded * LANES

    chunk = min(32, br)                   # 32-row sub-slabs stay register-resident
    assert br % chunk == 0
    kernel = _make_net_kernel(chunk, br // chunk, hidden_dtype)

    # Lane-dense relayout; pad only if N is not already tile-aligned.
    flat = t.reshape(-1).astype(jnp.float32)
    if padded_n != N:
        flat = jnp.pad(flat, (0, padded_n - N))
    t2d = flat.reshape(rows_padded, LANES)

    out2d = pl.pallas_call(
        kernel,
        out_shape=jax.ShapeDtypeStruct((rows_padded, LANES), jnp.float32),
        grid_spec=pltpu.PrefetchScalarGridSpec(
            num_scalar_prefetch=0,
            grid=(nb,),
            in_specs=[
                pl.BlockSpec(memory_space=pltpu.MemorySpace.SMEM),  # packed params
                pl.BlockSpec((br, LANES), lambda i: (i, 0)),        # t slab
            ],
            out_specs=pl.BlockSpec((br, LANES), lambda i: (i, 0)),
        ),
        compiler_params=pltpu.CompilerParams(
            dimension_semantics=("parallel",)),   # shard batch tiles over TCs
    )(packed, t2d)

    out_flat = out2d.reshape(-1)
    if padded_n != N:
        out_flat = out_flat[:N]
    return out_flat.reshape(N, 1)


def init_params(key):
    """Deterministic init mirroring torch.nn.Linear (uniform +-1/sqrt(fan_in)).
    Weights stored pre-transposed as [in_features, out_features]."""
    ks = jax.random.split(key, 8)

    def linear(kw, kb, fan_in, fan_out):
        bound = 1.0 / jnp.sqrt(jnp.float32(fan_in))
        w = jax.random.uniform(kw, (fan_in, fan_out), jnp.float32, -bound, bound)
        b = jax.random.uniform(kb, (1, fan_out), jnp.float32, -bound, bound)
        return w, b

    w1, b1 = linear(ks[0], ks[1], 1, 5)
    w2, b2 = linear(ks[2], ks[3], 5, 5)
    w3, b3 = linear(ks[4], ks[5], 5, 5)
    w4, b4 = linear(ks[6], ks[7], 5, 1)
    return dict(
        w1=w1, b1=b1, w2=w2, b2=b2, w3=w3, b3=b3, w4=w4, b4=b4,
        r=jnp.float32(0.1),       # nn.Parameter(0.1 * ones(1))
        x_bar=jnp.float32(1.0),   # x_bar_trainable=False -> torch.ones(1)
        x_ini=jnp.float32(0.0),   # torch.zeros(1)
    )


def net_reference(t, p):
    """Pure-JAX reference of the PyTorch forward pass."""
    h = jnp.tanh(t @ p["w1"] + p["b1"])
    h = jnp.tanh(h @ p["w2"] + p["b2"])
    h = jnp.tanh(h @ p["w3"] + p["b3"])
    out1 = h @ p["w4"] + p["b4"]
    out2 = p["x_bar"] + (p["x_ini"] - p["x_bar"]) * jnp.exp(-p["r"] * t)
    return out1 + out2


if __name__ == "__main__":
    key = jax.random.PRNGKey(0)
    k_param, k_t1, k_t2, k_t3 = jax.random.split(key, 4)
    params = init_params(k_param)

    # 1) Small batch: single grid step, single chunk, padded ragged tail.
    N1 = 64
    t1 = jax.random.uniform(k_t1, (N1, 1), jnp.float32, 0.0, 2.0)
    out1 = jax.block_until_ready(net_forward(t1, params))
    ref1 = net_reference(t1, params)
    assert out1.shape == (N1, 1)
    assert jnp.allclose(out1, ref1, atol=1e-5, rtol=1e-5), "mismatch (N=64)"

    # 2) Ragged batch (exercises the pad / slice slow path).
    N2 = 1000
    t2 = jax.random.uniform(k_t2, (N2, 1), jnp.float32, 0.0, 2.0)
    out2 = jax.block_until_ready(net_forward(t2, params))
    ref2 = net_reference(t2, params)
    assert out2.shape == (N2, 1)
    assert jnp.allclose(out2, ref2, atol=1e-5, rtol=1e-5), "mismatch (N=1000)"

    # 3) Tile-aligned batch: 2 "parallel" grid steps (v7x both TCs), multiple
    #    32-row strip-mine chunks per tile, no wrapper pad/slice.
    N3 = 16384
    t3 = jax.random.uniform(k_t3, (N3, 1), jnp.float32, 0.0, 2.0)
    out3 = jax.block_until_ready(net_forward(t3, params))
    ref3 = net_reference(t3, params)
    assert out3.shape == (N3, 1)
    assert jnp.allclose(out3, ref3, atol=1e-5, rtol=1e-5), "mismatch (N=16384)"

    print("KERNEL_OK")
</pallas_src>

<mosaic_0001>
module attributes {stable_mosaic.version = 11 : i64} {
  func.func @kernel(%arg0: i32, %arg1: memref<79xf32, #tpu.memory_space<smem>>, %arg2: memref<8x128xf32, #tpu.memory_space<vmem>>, %arg3: memref<8x128xf32, #tpu.memory_space<vmem>>) attributes {dimension_semantics = [#tpu.dimension_semantics<parallel>], iteration_bounds = array<i64: 1>, scalar_prefetch = 0 : i64, scratch_operands = 0 : i64, tpu.core_type = #tpu.core_type<tc>, window_params = [{transform_indices = @transform_0, window_bounds = array<i64: 79>}, {transform_indices = @transform_1, window_bounds = array<i64: 8, 128>}, {transform_indices = @transform_2, window_bounds = array<i64: 8, 128>}]} {
    %c0 = arith.constant 0 : index
    %0 = memref.load %arg1[%c0] : memref<79xf32, #tpu.memory_space<smem>>
    %c1 = arith.constant 1 : index
    %1 = memref.load %arg1[%c1] : memref<79xf32, #tpu.memory_space<smem>>
    %c2 = arith.constant 2 : index
    %2 = memref.load %arg1[%c2] : memref<79xf32, #tpu.memory_space<smem>>
    %c3 = arith.constant 3 : index
    %3 = memref.load %arg1[%c3] : memref<79xf32, #tpu.memory_space<smem>>
    %c4 = arith.constant 4 : index
    %4 = memref.load %arg1[%c4] : memref<79xf32, #tpu.memory_space<smem>>
    %c5 = arith.constant 5 : index
    %5 = memref.load %arg1[%c5] : memref<79xf32, #tpu.memory_space<smem>>
    %c6 = arith.constant 6 : index
    %6 = memref.load %arg1[%c6] : memref<79xf32, #tpu.memory_space<smem>>
    %c7 = arith.constant 7 : index
    %7 = memref.load %arg1[%c7] : memref<79xf32, #tpu.memory_space<smem>>
    %c8 = arith.constant 8 : index
    %8 = memref.load %arg1[%c8] : memref<79xf32, #tpu.memory_space<smem>>
    %c9 = arith.constant 9 : index
    %9 = memref.load %arg1[%c9] : memref<79xf32, #tpu.memory_space<smem>>
    %c10 = arith.constant 10 : index
    %10 = memref.load %arg1[%c10] : memref<79xf32, #tpu.memory_space<smem>>
    %c11 = arith.constant 11 : index
    %11 = memref.load %arg1[%c11] : memref<79xf32, #tpu.memory_space<smem>>
    %c12 = arith.constant 12 : index
    %12 = memref.load %arg1[%c12] : memref<79xf32, #tpu.memory_space<smem>>
    %c13 = arith.constant 13 : index
    %13 = memref.load %arg1[%c13] : memref<79xf32, #tpu.memory_space<smem>>
    %c14 = arith.constant 14 : index
    %14 = memref.load %arg1[%c14] : memref<79xf32, #tpu.memory_space<smem>>
    %c15 = arith.constant 15 : index
    %15 = memref.load %arg1[%c15] : memref<79xf32, #tpu.memory_space<smem>>
    %c16 = arith.constant 16 : index
    %16 = memref.load %arg1[%c16] : memref<79xf32, #tpu.memory_space<smem>>
    %c17 = arith.constant 17 : index
    %17 = memref.load %arg1[%c17] : memref<79xf32, #tpu.memory_space<smem>>
    %c18 = arith.constant 18 : index
    %18 = memref.load %arg1[%c18] : memref<79xf32, #tpu.memory_space<smem>>
    %c19 = arith.constant 19 : index
    %19 = memref.load %arg1[%c19] : memref<79xf32, #tpu.memory_space<smem>>
    %c20 = arith.constant 20 : index
    %20 = memref.load %arg1[%c20] : memref<79xf32, #tpu.memory_space<smem>>
    %c21 = arith.constant 21 : index
    %21 = memref.load %arg1[%c21] : memref<79xf32, #tpu.memory_space<smem>>
    %c22 = arith.constant 22 : index
    %22 = memref.load %arg1[%c22] : memref<79xf32, #tpu.memory_space<smem>>
    %c23 = arith.constant 23 : index
    %23 = memref.load %arg1[%c23] : memref<79xf32, #tpu.memory_space<smem>>
    %c24 = arith.constant 24 : index
    %24 = memref.load %arg1[%c24] : memref<79xf32, #tpu.memory_space<smem>>
    %c25 = arith.constant 25 : index
    %25 = memref.load %arg1[%c25] : memref<79xf32, #tpu.memory_space<smem>>
    %c26 = arith.constant 26 : index
    %26 = memref.load %arg1[%c26] : memref<79xf32, #tpu.memory_space<smem>>
    %c27 = arith.constant 27 : index
    %27 = memref.load %arg1[%c27] : memref<79xf32, #tpu.memory_space<smem>>
    %c28 = arith.constant 28 : index
    %28 = memref.load %arg1[%c28] : memref<79xf32, #tpu.memory_space<smem>>
    %c29 = arith.constant 29 : index
    %29 = memref.load %arg1[%c29] : memref<79xf32, #tpu.memory_space<smem>>
    %c30 = arith.constant 30 : index
    %30 = memref.load %arg1[%c30] : memref<79xf32, #tpu.memory_space<smem>>
    %c31 = arith.constant 31 : index
    %31 = memref.load %arg1[%c31] : memref<79xf32, #tpu.memory_space<smem>>
    %c32 = arith.constant 32 : index
    %32 = memref.load %arg1[%c32] : memref<79xf32, #tpu.memory_space<smem>>
    %c33 = arith.constant 33 : index
    %33 = memref.load %arg1[%c33] : memref<79xf32, #tpu.memory_space<smem>>
    %c34 = arith.constant 34 : index
    %34 = memref.load %arg1[%c34] : memref<79xf32, #tpu.memory_space<smem>>
    %c35 = arith.constant 35 : index
    %35 = memref.load %arg1[%c35] : memref<79xf32, #tpu.memory_space<smem>>
    %c36 = arith.constant 36 : index
    %36 = memref.load %arg1[%c36] : memref<79xf32, #tpu.memory_space<smem>>
    %c37 = arith.constant 37 : index
    %37 = memref.load %arg1[%c37] : memref<79xf32, #tpu.memory_space<smem>>
    %c38 = arith.constant 38 : index
    %38 = memref.load %arg1[%c38] : memref<79xf32, #tpu.memory_space<smem>>
    %c39 = arith.constant 39 : index
    %39 = memref.load %arg1[%c39] : memref<79xf32, #tpu.memory_space<smem>>
    %c40 = arith.constant 40 : index
    %40 = memref.load %arg1[%c40] : memref<79xf32, #tpu.memory_space<smem>>
    %c41 = arith.constant 41 : index
    %41 = memref.load %arg1[%c41] : memref<79xf32, #tpu.memory_space<smem>>
    %c42 = arith.constant 42 : index
    %42 = memref.load %arg1[%c42] : memref<79xf32, #tpu.memory_space<smem>>
    %c43 = arith.constant 43 : index
    %43 = memref.load %arg1[%c43] : memref<79xf32, #tpu.memory_space<smem>>
    %c44 = arith.constant 44 : index
    %44 = memref.load %arg1[%c44] : memref<79xf32, #tpu.memory_space<smem>>
    %c45 = arith.constant 45 : index
    %45 = memref.load %arg1[%c45] : memref<79xf32, #tpu.memory_space<smem>>
    %c46 = arith.constant 46 : index
    %46 = memref.load %arg1[%c46] : memref<79xf32, #tpu.memory_space<smem>>
    %c47 = arith.constant 47 : index
    %47 = memref.load %arg1[%c47] : memref<79xf32, #tpu.memory_space<smem>>
    %c48 = arith.constant 48 : index
    %48 = memref.load %arg1[%c48] : memref<79xf32, #tpu.memory_space<smem>>
    %c49 = arith.constant 49 : index
    %49 = memref.load %arg1[%c49] : memref<79xf32, #tpu.memory_space<smem>>
    %c50 = arith.constant 50 : index
    %50 = memref.load %arg1[%c50] : memref<79xf32, #tpu.memory_space<smem>>
    %c51 = arith.constant 51 : index
    %51 = memref.load %arg1[%c51] : memref<79xf32, #tpu.memory_space<smem>>
    %c52 = arith.constant 52 : index
    %52 = memref.load %arg1[%c52] : memref<79xf32, #tpu.memory_space<smem>>
    %c53 = arith.constant 53 : index
    %53 = memref.load %arg1[%c53] : memref<79xf32, #tpu.memory_space<smem>>
    %c54 = arith.constant 54 : index
    %54 = memref.load %arg1[%c54] : memref<79xf32, #tpu.memory_space<smem>>
    %c55 = arith.constant 55 : index
    %55 = memref.load %arg1[%c55] : memref<79xf32, #tpu.memory_space<smem>>
    %c56 = arith.constant 56 : index
    %56 = memref.load %arg1[%c56] : memref<79xf32, #tpu.memory_space<smem>>
    %c57 = arith.constant 57 : index
    %57 = memref.load %arg1[%c57] : memref<79xf32, #tpu.memory_space<smem>>
    %c58 = arith.constant 58 : index
    %58 = memref.load %arg1[%c58] : memref<79xf32, #tpu.memory_space<smem>>
    %c59 = arith.constant 59 : index
    %59 = memref.load %arg1[%c59] : memref<79xf32, #tpu.memory_space<smem>>
    %c60 = arith.constant 60 : index
    %60 = memref.load %arg1[%c60] : memref<79xf32, #tpu.memory_space<smem>>
    %c61 = arith.constant 61 : index
    %61 = memref.load %arg1[%c61] : memref<79xf32, #tpu.memory_space<smem>>
    %c62 = arith.constant 62 : index
    %62 = memref.load %arg1[%c62] : memref<79xf32, #tpu.memory_space<smem>>
    %c63 = arith.constant 63 : index
    %63 = memref.load %arg1[%c63] : memref<79xf32, #tpu.memory_space<smem>>
    %c64 = arith.constant 64 : index
    %64 = memref.load %arg1[%c64] : memref<79xf32, #tpu.memory_space<smem>>
    %c65 = arith.constant 65 : index
    %65 = memref.load %arg1[%c65] : memref<79xf32, #tpu.memory_space<smem>>
    %c66 = arith.constant 66 : index
    %66 = memref.load %arg1[%c66] : memref<79xf32, #tpu.memory_space<smem>>
    %c67 = arith.constant 67 : index
    %67 = memref.load %arg1[%c67] : memref<79xf32, #tpu.memory_space<smem>>
    %c68 = arith.constant 68 : index
    %68 = memref.load %arg1[%c68] : memref<79xf32, #tpu.memory_space<smem>>
    %c69 = arith.constant 69 : index
    %69 = memref.load %arg1[%c69] : memref<79xf32, #tpu.memory_space<smem>>
    %c70 = arith.constant 70 : index
    %70 = memref.load %arg1[%c70] : memref<79xf32, #tpu.memory_space<smem>>
    %c71 = arith.constant 71 : index
    %71 = memref.load %arg1[%c71] : memref<79xf32, #tpu.memory_space<smem>>
    %c72 = arith.constant 72 : index
    %72 = memref.load %arg1[%c72] : memref<79xf32, #tpu.memory_space<smem>>
    %c73 = arith.constant 73 : index
    %73 = memref.load %arg1[%c73] : memref<79xf32, #tpu.memory_space<smem>>
    %c74 = arith.constant 74 : index
    %74 = memref.load %arg1[%c74] : memref<79xf32, #tpu.memory_space<smem>>
    %c75 = arith.constant 75 : index
    %75 = memref.load %arg1[%c75] : memref<79xf32, #tpu.memory_space<smem>>
    %c77 = arith.constant 77 : index
    %76 = memref.load %arg1[%c77] : memref<79xf32, #tpu.memory_space<smem>>
    %77 = arith.addf %75, %76 : f32
    %c76 = arith.constant 76 : index
    %78 = memref.load %arg1[%c76] : memref<79xf32, #tpu.memory_space<smem>>
    %cst = arith.constant 0.000000e+00 : f32
    %79 = arith.subf %cst, %78 : f32
    %c78 = arith.constant 78 : index
    %80 = memref.load %arg1[%c78] : memref<79xf32, #tpu.memory_space<smem>>
    %c77_0 = arith.constant 77 : index
    %81 = memref.load %arg1[%c77_0] : memref<79xf32, #tpu.memory_space<smem>>
    %82 = arith.subf %80, %81 : f32
    %c0_i32 = arith.constant 0 : i32
    %c1_i32 = arith.constant 1 : i32
    %83 = arith.muli %c0_i32, %c1_i32 : i32
    %c0_i32_1 = arith.constant 0 : i32
    %84 = arith.addi %c0_i32_1, %83 : i32
    %c8_i32 = arith.constant 8 : i32
    %85 = arith.muli %84, %c8_i32 : i32
    %86 = tpu.assume_multiple %85, 8 : i32
    %87 = arith.index_cast %86 : i32 to index
    %c0_2 = arith.constant 0 : index
    %88 = vector.load %arg2[%87, %c0_2] : memref<8x128xf32, #tpu.memory_space<vmem>>, vector<8x128xf32>
    %89 = vector.broadcast %0 : f32 to vector<8x128xf32>
    %90 = arith.mulf %89, %88 : vector<8x128xf32>
    %91 = vector.broadcast %5 : f32 to vector<8x128xf32>
    %92 = arith.addf %90, %91 : vector<8x128xf32>
    %93 = math.tanh %92 : vector<8x128xf32>
    %94 = vector.broadcast %1 : f32 to vector<8x128xf32>
    %95 = arith.mulf %94, %88 : vector<8x128xf32>
    %96 = vector.broadcast %6 : f32 to vector<8x128xf32>
    %97 = arith.addf %95, %96 : vector<8x128xf32>
    %98 = math.tanh %97 : vector<8x128xf32>
    %99 = vector.broadcast %2 : f32 to vector<8x128xf32>
    %100 = arith.mulf %99, %88 : vector<8x128xf32>
    %101 = vector.broadcast %7 : f32 to vector<8x128xf32>
    %102 = arith.addf %100, %101 : vector<8x128xf32>
    %103 = math.tanh %102 : vector<8x128xf32>
    %104 = vector.broadcast %3 : f32 to vector<8x128xf32>
    %105 = arith.mulf %104, %88 : vector<8x128xf32>
    %106 = vector.broadcast %8 : f32 to vector<8x128xf32>
    %107 = arith.addf %105, %106 : vector<8x128xf32>
    %108 = math.tanh %107 : vector<8x128xf32>
    %109 = vector.broadcast %4 : f32 to vector<8x128xf32>
    %110 = arith.mulf %109, %88 : vector<8x128xf32>
    %111 = vector.broadcast %9 : f32 to vector<8x128xf32>
    %112 = arith.addf %110, %111 : vector<8x128xf32>
    %113 = math.tanh %112 : vector<8x128xf32>
    %114 = vector.broadcast %10 : f32 to vector<8x128xf32>
    %115 = arith.mulf %93, %114 : vector<8x128xf32>
    %116 = vector.broadcast %15 : f32 to vector<8x128xf32>
    %117 = arith.mulf %98, %116 : vector<8x128xf32>
    %118 = arith.addf %115, %117 : vector<8x128xf32>
    %119 = vector.broadcast %20 : f32 to vector<8x128xf32>
    %120 = arith.mulf %103, %119 : vector<8x128xf32>
    %121 = arith.addf %118, %120 : vector<8x128xf32>
    %122 = vector.broadcast %25 : f32 to vector<8x128xf32>
    %123 = arith.mulf %108, %122 : vector<8x128xf32>
    %124 = arith.addf %121, %123 : vector<8x128xf32>
    %125 = vector.broadcast %30 : f32 to vector<8x128xf32>
    %126 = arith.mulf %113, %125 : vector<8x128xf32>
    %127 = arith.addf %124, %126 : vector<8x128xf32>
    %128 = vector.broadcast %35 : f32 to vector<8x128xf32>
    %129 = arith.addf %127, %128 : vector<8x128xf32>
    %130 = math.tanh %129 : vector<8x128xf32>
    %131 = vector.broadcast %11 : f32 to vector<8x128xf32>
    %132 = arith.mulf %93, %131 : vector<8x128xf32>
    %133 = vector.broadcast %16 : f32 to vector<8x128xf32>
    %134 = arith.mulf %98, %133 : vector<8x128xf32>
    %135 = arith.addf %132, %134 : vector<8x128xf32>
    %136 = vector.broadcast %21 : f32 to vector<8x128xf32>
    %137 = arith.mulf %103, %136 : vector<8x128xf32>
    %138 = arith.addf %135, %137 : vector<8x128xf32>
    %139 = vector.broadcast %26 : f32 to vector<8x128xf32>
    %140 = arith.mulf %108, %139 : vector<8x128xf32>
    %141 = arith.addf %138, %140 : vector<8x128xf32>
    %142 = vector.broadcast %31 : f32 to vector<8x128xf32>
    %143 = arith.mulf %113, %142 : vector<8x128xf32>
    %144 = arith.addf %141, %143 : vector<8x128xf32>
    %145 = vector.broadcast %36 : f32 to vector<8x128xf32>
    %146 = arith.addf %144, %145 : vector<8x128xf32>
    %147 = math.tanh %146 : vector<8x128xf32>
    %148 = vector.broadcast %12 : f32 to vector<8x128xf32>
    %149 = arith.mulf %93, %148 : vector<8x128xf32>
    %150 = vector.broadcast %17 : f32 to vector<8x128xf32>
    %151 = arith.mulf %98, %150 : vector<8x128xf32>
    %152 = arith.addf %149, %151 : vector<8x128xf32>
    %153 = vector.broadcast %22 : f32 to vector<8x128xf32>
    %154 = arith.mulf %103, %153 : vector<8x128xf32>
    %155 = arith.addf %152, %154 : vector<8x128xf32>
    %156 = vector.broadcast %27 : f32 to vector<8x128xf32>
    %157 = arith.mulf %108, %156 : vector<8x128xf32>
    %158 = arith.addf %155, %157 : vector<8x128xf32>
    %159 = vector.broadcast %32 : f32 to vector<8x128xf32>
    %160 = arith.mulf %113, %159 : vector<8x128xf32>
    %161 = arith.addf %158, %160 : vector<8x128xf32>
    %162 = vector.broadcast %37 : f32 to vector<8x128xf32>
    %163 = arith.addf %161, %162 : vector<8x128xf32>
    %164 = math.tanh %163 : vector<8x128xf32>
    %165 = vector.broadcast %13 : f32 to vector<8x128xf32>
    %166 = arith.mulf %93, %165 : vector<8x128xf32>
    %167 = vector.broadcast %18 : f32 to vector<8x128xf32>
    %168 = arith.mulf %98, %167 : vector<8x128xf32>
    %169 = arith.addf %166, %168 : vector<8x128xf32>
    %170 = vector.broadcast %23 : f32 to vector<8x128xf32>
    %171 = arith.mulf %103, %170 : vector<8x128xf32>
    %172 = arith.addf %169, %171 : vector<8x128xf32>
    %173 = vector.broadcast %28 : f32 to vector<8x128xf32>
    %174 = arith.mulf %108, %173 : vector<8x128xf32>
    %175 = arith.addf %172, %174 : vector<8x128xf32>
    %176 = vector.broadcast %33 : f32 to vector<8x128xf32>
    %177 = arith.mulf %113, %176 : vector<8x128xf32>
    %178 = arith.addf %175, %177 : vector<8x128xf32>
    %179 = vector.broadcast %38 : f32 to vector<8x128xf32>
    %180 = arith.addf %178, %179 : vector<8x128xf32>
    %181 = math.tanh %180 : vector<8x128xf32>
    %182 = vector.broadcast %14 : f32 to vector<8x128xf32>
    %183 = arith.mulf %93, %182 : vector<8x128xf32>
    %184 = vector.broadcast %19 : f32 to vector<8x128xf32>
    %185 = arith.mulf %98, %184 : vector<8x128xf32>
    %186 = arith.addf %183, %185 : vector<8x128xf32>
    %187 = vector.broadcast %24 : f32 to vector<8x128xf32>
    %188 = arith.mulf %103, %187 : vector<8x128xf32>
    %189 = arith.addf %186, %188 : vector<8x128xf32>
    %190 = vector.broadcast %29 : f32 to vector<8x128xf32>
    %191 = arith.mulf %108, %190 : vector<8x128xf32>
    %192 = arith.addf %189, %191 : vector<8x128xf32>
    %193 = vector.broadcast %34 : f32 to vector<8x128xf32>
    %194 = arith.mulf %113, %193 : vector<8x128xf32>
    %195 = arith.addf %192, %194 : vector<8x128xf32>
    %196 = vector.broadcast %39 : f32 to vector<8x128xf32>
    %197 = arith.addf %195, %196 : vector<8x128xf32>
    %198 = math.tanh %197 : vector<8x128xf32>
    %199 = vector.broadcast %40 : f32 to vector<8x128xf32>
    %200 = arith.mulf %130, %199 : vector<8x128xf32>
    %201 = vector.broadcast %45 : f32 to vector<8x128xf32>
    %202 = arith.mulf %147, %201 : vector<8x128xf32>
    %203 = arith.addf %200, %202 : vector<8x128xf32>
    %204 = vector.broadcast %50 : f32 to vector<8x128xf32>
    %205 = arith.mulf %164, %204 : vector<8x128xf32>
    %206 = arith.addf %203, %205 : vector<8x128xf32>
    %207 = vector.broadcast %55 : f32 to vector<8x128xf32>
    %208 = arith.mulf %181, %207 : vector<8x128xf32>
    %209 = arith.addf %206, %208 : vector<8x128xf32>
    %210 = vector.broadcast %60 : f32 to vector<8x128xf32>
    %211 = arith.mulf %198, %210 : vector<8x128xf32>
    %212 = arith.addf %209, %211 : vector<8x128xf32>
    %213 = vector.broadcast %65 : f32 to vector<8x128xf32>
    %214 = arith.addf %212, %213 : vector<8x128xf32>
    %215 = math.tanh %214 : vector<8x128xf32>
    %216 = vector.broadcast %41 : f32 to vector<8x128xf32>
    %217 = arith.mulf %130, %216 : vector<8x128xf32>
    %218 = vector.broadcast %46 : f32 to vector<8x128xf32>
    %219 = arith.mulf %147, %218 : vector<8x128xf32>
    %220 = arith.addf %217, %219 : vector<8x128xf32>
    %221 = vector.broadcast %51 : f32 to vector<8x128xf32>
    %222 = arith.mulf %164, %221 : vector<8x128xf32>
    %223 = arith.addf %220, %222 : vector<8x128xf32>
    %224 = vector.broadcast %56 : f32 to vector<8x128xf32>
    %225 = arith.mulf %181, %224 : vector<8x128xf32>
    %226 = arith.addf %223, %225 : vector<8x128xf32>
    %227 = vector.broadcast %61 : f32 to vector<8x128xf32>
    %228 = arith.mulf %198, %227 : vector<8x128xf32>
    %229 = arith.addf %226, %228 : vector<8x128xf32>
    %230 = vector.broadcast %66 : f32 to vector<8x128xf32>
    %231 = arith.addf %229, %230 : vector<8x128xf32>
    %232 = math.tanh %231 : vector<8x128xf32>
    %233 = vector.broadcast %42 : f32 to vector<8x128xf32>
    %234 = arith.mulf %130, %233 : vector<8x128xf32>
    %235 = vector.broadcast %47 : f32 to vector<8x128xf32>
    %236 = arith.mulf %147, %235 : vector<8x128xf32>
    %237 = arith.addf %234, %236 : vector<8x128xf32>
    %238 = vector.broadcast %52 : f32 to vector<8x128xf32>
    %239 = arith.mulf %164, %238 : vector<8x128xf32>
    %240 = arith.addf %237, %239 : vector<8x128xf32>
    %241 = vector.broadcast %57 : f32 to vector<8x128xf32>
    %242 = arith.mulf %181, %241 : vector<8x128xf32>
    %243 = arith.addf %240, %242 : vector<8x128xf32>
    %244 = vector.broadcast %62 : f32 to vector<8x128xf32>
    %245 = arith.mulf %198, %244 : vector<8x128xf32>
    %246 = arith.addf %243, %245 : vector<8x128xf32>
    %247 = vector.broadcast %67 : f32 to vector<8x128xf32>
    %248 = arith.addf %246, %247 : vector<8x128xf32>
    %249 = math.tanh %248 : vector<8x128xf32>
    %250 = vector.broadcast %43 : f32 to vector<8x128xf32>
    %251 = arith.mulf %130, %250 : vector<8x128xf32>
    %252 = vector.broadcast %48 : f32 to vector<8x128xf32>
    %253 = arith.mulf %147, %252 : vector<8x128xf32>
    %254 = arith.addf %251, %253 : vector<8x128xf32>
    %255 = vector.broadcast %53 : f32 to vector<8x128xf32>
    %256 = arith.mulf %164, %255 : vector<8x128xf32>
    %257 = arith.addf %254, %256 : vector<8x128xf32>
    %258 = vector.broadcast %58 : f32 to vector<8x128xf32>
    %259 = arith.mulf %181, %258 : vector<8x128xf32>
    %260 = arith.addf %257, %259 : vector<8x128xf32>
    %261 = vector.broadcast %63 : f32 to vector<8x128xf32>
    %262 = arith.mulf %198, %261 : vector<8x128xf32>
    %263 = arith.addf %260, %262 : vector<8x128xf32>
    %264 = vector.broadcast %68 : f32 to vector<8x128xf32>
    %265 = arith.addf %263, %264 : vector<8x128xf32>
    %266 = math.tanh %265 : vector<8x128xf32>
    %267 = vector.broadcast %44 : f32 to vector<8x128xf32>
    %268 = arith.mulf %130, %267 : vector<8x128xf32>
    %269 = vector.broadcast %49 : f32 to vector<8x128xf32>
    %270 = arith.mulf %147, %269 : vector<8x128xf32>
    %271 = arith.addf %268, %270 : vector<8x128xf32>
    %272 = vector.broadcast %54 : f32 to vector<8x128xf32>
    %273 = arith.mulf %164, %272 : vector<8x128xf32>
    %274 = arith.addf %271, %273 : vector<8x128xf32>
    %275 = vector.broadcast %59 : f32 to vector<8x128xf32>
    %276 = arith.mulf %181, %275 : vector<8x128xf32>
    %277 = arith.addf %274, %276 : vector<8x128xf32>
    %278 = vector.broadcast %64 : f32 to vector<8x128xf32>
    %279 = arith.mulf %198, %278 : vector<8x128xf32>
    %280 = arith.addf %277, %279 : vector<8x128xf32>
    %281 = vector.broadcast %69 : f32 to vector<8x128xf32>
    %282 = arith.addf %280, %281 : vector<8x128xf32>
    %283 = math.tanh %282 : vector<8x128xf32>
    %284 = vector.broadcast %70 : f32 to vector<8x128xf32>
    %285 = arith.mulf %215, %284 : vector<8x128xf32>
    %286 = vector.broadcast %71 : f32 to vector<8x128xf32>
    %287 = arith.mulf %232, %286 : vector<8x128xf32>
    %288 = arith.addf %285, %287 : vector<8x128xf32>
    %289 = vector.broadcast %72 : f32 to vector<8x128xf32>
    %290 = arith.mulf %249, %289 : vector<8x128xf32>
    %291 = arith.addf %288, %290 : vector<8x128xf32>
    %292 = vector.broadcast %73 : f32 to vector<8x128xf32>
    %293 = arith.mulf %266, %292 : vector<8x128xf32>
    %294 = arith.addf %291, %293 : vector<8x128xf32>
    %295 = vector.broadcast %74 : f32 to vector<8x128xf32>
    %296 = arith.mulf %283, %295 : vector<8x128xf32>
    %297 = arith.addf %294, %296 : vector<8x128xf32>
    %298 = vector.broadcast %79 : f32 to vector<8x128xf32>
    %299 = arith.mulf %298, %88 : vector<8x128xf32>
    %300 = math.exp %299 : vector<8x128xf32>
    %301 = vector.broadcast %82 : f32 to vector<8x128xf32>
    %302 = arith.mulf %301, %300 : vector<8x128xf32>
    %303 = arith.addf %297, %302 : vector<8x128xf32>
    %304 = vector.broadcast %77 : f32 to vector<8x128xf32>
    %305 = arith.addf %303, %304 : vector<8x128xf32>
    %306 = arith.index_cast %86 : i32 to index
    %c0_3 = arith.constant 0 : index
    %307 = vector.load %arg3[%306, %c0_3] : memref<8x128xf32, #tpu.memory_space<vmem>>, vector<8x128xf32>
    tpu.vector_store %arg3[%306, %c0_3], %305 {strides = array<i32>} : memref<8x128xf32, #tpu.memory_space<vmem>>, vector<8x128xf32>,
    %c1_i32_4 = arith.constant 1 : i32
    return
  }
  func.func @transform_0(%arg0: i32) -> i32 {
    %c0_i32 = arith.constant 0 : i32
    %c0_i32_0 = arith.constant 0 : i32
    return %c0_i32 : i32
  }
  func.func @transform_1(%arg0: i32) -> (i32, i32) {
    %c0_i32 = arith.constant 0 : i32
    %c0_i32_0 = arith.constant 0 : i32
    return %arg0, %c0_i32 : i32, i32
  }
  func.func @transform_2(%arg0: i32) -> (i32, i32) {
    %c0_i32 = arith.constant 0 : i32
    %c0_i32_0 = arith.constant 0 : i32
    return %arg0, %c0_i32 : i32, i32
  }
}

</mosaic_0001>

<bundles_post_ra>
// kernel: tpu_custom_call.1
= control target key start
LH: loop header
LB: loop body
LE: loop exit
PB: predicated region body
PF: predicated region fallthrough
CT: control target
= control target key end

     0   :  { %7 = vsyncpa [#allocation5], 0  ;;  %s820_s0 = inlined_call_operand.hbm [shape: f32[79], index: 0, kind: input, shape index: {}]   ;;  %s821_s1 = inlined_call_operand.hbm [shape: f32[8,128], index: 1, kind: input, shape index: {}]   ;;  %s822_s2 = inlined_call_operand.hbm [shape: f32[8,128], index: 2, kind: output, shape index: {}]  }
   0x1   :  { %8 = vsyncpa [#allocation3], 0 }
   0x2   :  { %9 = vsyncpa [#allocation4], 0  ;;  %s466_s11 = scalar_lea.hbm %s820_s0, 16 }
   0x3   :  { %p467_p0 = scmp.ne.s32.totalorder %s820_s0, %s466_s11  ;;  %p470_p1 = scmp.lt.u32.totalorder %s466_s11, %s820_s0 }
   0x5   :  { %p472_p2 = pnand %p470_p1, %p467_p0 }
   0x7   :  { %475 = shalt.err (!%p472_p2)
}
   0x8   :  { %s526_s16 = smov [#allocation2]   ;;  %s527_s19 = smov [#allocation6]  }
   0x9   :  { %17 = dma.hbm_to_smem %s820_s0, 16, %s526_s16, [#allocation5]  }
   0xa   :  { %s24_s20 = sshll.u32 %s527_s19, 4  ;;  %s476_s23 = scalar_lea.hbm %s821_s1, 128  ;;  %s25_s20 = int_to_ptr.vmem [resolvable:$true] %s24_s20 }
   0xb   :  { %p477_p3 = scmp.ne.s32.totalorder %s821_s1, %s476_s23  ;;  %p480_p4 = scmp.lt.u32.totalorder %s476_s23, %s821_s1 }
   0xd   :  { %p482_p5 = pnand %p480_p4, %p477_p3 }
   0xf   :  { %485 = shalt.err (!%p482_p5)
}
  0x10   :  { %s486_s28 = scalar_lea.vmem %s25_s20, 128  ;;  %p491_p7 = scmp.lt.s32.totalorder %s25_s20, %s25_s20 }
  0x11   :  { %p487_p6 = scmp.ne.s32.totalorder %s25_s20, %s486_s28  ;;  %p492_p8 = scmp.lt.s32.totalorder %s486_s28, %s486_s28 }
  0x13   :  { %p493_p9 = por %p492_p8, %p491_p7 }
  0x15   :  { %p494_p10 = pnand %p493_p9, %p487_p6 }
  0x17   :  { %497 = shalt.err (!%p494_p10)
}
  0x18   :  { %27 = dma.hbm_to_vmem [thread:$0]  %s821_s1, 128, %s25_s20, [#allocation3]  }
  0x19   :  { %520 = dma.done.wait [#allocation5], 16  }
  0x1a   :  { %521 = vsyncadd [#allocation5], 4294967280 }
  0x1b   :  { %522 = dma.done.wait [#allocation3], 128  }
  0x1c   :  { %523 = vsyncadd [#allocation3], 4294967168 }
  0x1d   :  { %34 = sfence }
  0x1e   :  { %s35_s30 = sld [smem:[#allocation2]]  ;;  %s353_s3 = sld [smem:[#allocation2 + $0x1]]  ;;  %v578_v0 = vld [vmem:[#allocation6] sm:$0xff] }
  0x1f   :  { %s354_s4 = sld [smem:[#allocation2 + $0x2]]  ;;  %s355_s5 = sld [smem:[#allocation2 + $0x3]] }
  0x20   :  { %s568_s6 = sld [smem:[#allocation2 + $0x4]]  ;;  %s357_s7 = sld [smem:[#allocation2 + $0x5]] }
  0x21   :  { %s570_s8 = sld [smem:[#allocation2 + $0x6]]  ;;  %s572_s9 = sld [smem:[#allocation2 + $0x7]] }
  0x22   :  { %s574_s10 = sld [smem:[#allocation2 + $0x8]]  ;;  %s576_s11 = sld [smem:[#allocation2 + $0x9]] }
  0x23   :  { %s580_s1 = sld [smem:[#allocation2 + $0xa]]  ;;  %s582_s12 = sld [smem:[#allocation2 + $0xb]] }
  0x24   :  { %s584_s13 = sld [smem:[#allocation2 + $0xc]]  ;;  %s586_s14 = sld [smem:[#allocation2 + $0xd]]  ;;  %v118_v1 = vstv %s35_s30  ;;  %v123_v2 = vstv %s353_s3 }
  0x25   :  { %s588_s15 = sld [smem:[#allocation2 + $0xe]]  ;;  %s590_s16 = sld [smem:[#allocation2 + $0xf]]  ;;  %v119_v3 = vmul.f32 %v118_v1, %v578_v0  ;;  %v124_v4 = vmul.f32 %v123_v2, %v578_v0  ;;  %v128_v5 = vstv %s354_s4  ;;  %v133_v6 = vstv %s355_s5 }
  0x26   :  { %s594_s17 = sld [smem:[#allocation2 + $0x10]]  ;;  %s596_s18 = sld [smem:[#allocation2 + $0x11]]  ;;  %v120_v7 = vstv %s357_s7  ;;  %v129_v8 = vmul.f32 %v128_v5, %v578_v0  ;;  %v134_v9 = vmul.f32 %v133_v6, %v578_v0  ;;  %v138_v10 = vstv %s568_s6 }
  0x27   :  { %s601_s19 = sld [smem:[#allocation2 + $0x12]]  ;;  %s603_s20 = sld [smem:[#allocation2 + $0x13]]  ;;  %v121_v11 = vadd.f32 %v120_v7, %v119_v3  ;;  %v125_v12 = vstv %s570_s8  ;;  %v130_v13 = vstv %s572_s9  ;;  %v139_v14 = vmul.f32 %v138_v10, %v578_v0 }
  0x28   :  { %s608_s21 = sld [smem:[#allocation2 + $0x14]]  ;;  %s610_s22 = sld [smem:[#allocation2 + $0x15]]  ;;  %v126_v15 = vadd.f32 %v125_v12, %v124_v4  ;;  %v131_v16 = vadd.f32 %v130_v13, %v129_v8  ;;  %v135_v17 = vstv %s574_s10  ;;  %v140_v18 = vstv %s576_s11 }
  0x29   :  { %s614_s23 = sld [smem:[#allocation2 + $0x16]]  ;;  %s616_s24 = sld [smem:[#allocation2 + $0x17]]  ;;  %434 = vtanh.f32 %v121_v11  ;;  %v136_v19 = vadd.f32 %v135_v17, %v134_v9  ;;  %v141_v20 = vadd.f32 %v140_v18, %v139_v14  ;;  %v143_v21 = vstv %s580_s1 }
  0x2a   :  { %s618_s25 = sld [smem:[#allocation2 + $0x18]]  ;;  %s620_s26 = sld [smem:[#allocation2 + $0x19]]  ;;  %436 = vtanh.f32 %v126_v15  ;;  %v160_v23 = vstv %s582_s12  ;;  %v177_v24 = vstv %s584_s13  ;;  %v194_v25 = vstv %s586_s14 }
  0x2b   :  { %s622_s27 = sld [smem:[#allocation2 + $0x1a]]  ;;  %s624_s28 = sld [smem:[#allocation2 + $0x1b]]  ;;  %438 = vtanh.f32 %v131_v16  ;;  %v145_v22 = vstv %s590_s16  ;;  %v211_v29 = vstv %s588_s15 }
  0x2c   :  { %s626_s0 = sld [smem:[#allocation2 + $0x1c]]  ;;  %s628_s29 = sld [smem:[#allocation2 + $0x1d]]  ;;  %440 = vtanh.f32 %v136_v19  ;;  %v162_v26 = vstv %s594_s17  ;;  %v179_v27 = vstv %s596_s18 }
  0x2d   :  { %s630_s30 = sld [smem:[#allocation2 + $0x1e]]  ;;  %s632_s3 = sld [smem:[#allocation2 + $0x1f]]  ;;  %442 = vtanh.f32 %v141_v20  ;;  %v196_v28 = vstv %s601_s19  ;;  %v213_v33 = vstv %s603_s20 }
  0x2e   :  { %s634_s4 = sld [smem:[#allocation2 + $0x20]]  ;;  %s637_s5 = sld [smem:[#allocation2 + $0x23]]  ;;  %v148_v30 = vstv %s608_s21  ;;  %v165_v31 = vstv %s610_s22 }
  0x2f   :  { %s643_s6 = sld [smem:[#allocation2 + $0x24]]  ;;  %v182_v32 = vstv %s614_s23  ;;  %v199_v36 = vstv %s616_s24  ;;  %s659_s7 = sld [smem:[#allocation2 + $0x21]] }
  0x30   :  { %v151_v34 = vstv %s620_s26  ;;  %v216_v37 = vstv %s618_s25  ;;  %s661_s8 = sld [smem:[#allocation2 + $0x25]]  ;;  %s671_s9 = sld [smem:[#allocation2 + $0x22]] }
  0x31   :  { %v168_v35 = vstv %s622_s27  ;;  %v185_v40 = vstv %s624_s28  ;;  %s673_s10 = sld [smem:[#allocation2 + $0x26]]  ;;  %s676_s11 = sld [smem:[#allocation2 + $0x27]] }
  0x32   :  { %v202_v41 = vstv %s626_s0  ;;  %v219_v42 = vstv %s628_s29  ;;  %s678_s1 = sld [smem:[#allocation2 + $0x28]]  ;;  %s683_s12 = sld [smem:[#allocation2 + $0x29]] }
  0x33   :  { %v657_v38 = vpop.eup %434  ;;  %v154_v39 = vstv %s630_s30  ;;  %v171_v46 = vstv %s632_s3  ;;  %s685_s13 = sld [smem:[#allocation2 + $0x2a]]  ;;  %s687_s14 = sld [smem:[#allocation2 + $0x2b]] }
  0x34   :  { %v437_v43 = vpop.eup %436  ;;  %v144_v44 = vmul.f32 %v657_v38, %v143_v21  ;;  %v161_v45 = vmul.f32 %v657_v38, %v160_v23  ;;  %v178_v47 = vmul.f32 %v657_v38, %v177_v24  ;;  %v188_v52 = vstv %s634_s4  ;;  %s689_s16 = sld [smem:[#allocation2 + $0x2c]]  ;;  %s693_s17 = sld [smem:[#allocation2 + $0x2d]] }
  0x35   :  { %v439_v48 = vpop.eup %438  ;;  %v146_v49 = vmul.f32 %v437_v43, %v145_v22  ;;  %v163_v50 = vmul.f32 %v437_v43, %v162_v26  ;;  %v180_v51 = vmul.f32 %v437_v43, %v179_v27  ;;  %v157_v55 = vstv %s637_s5  ;;  %s695_s18 = sld [smem:[#allocation2 + $0x2e]]  ;;  %s699_s19 = sld [smem:[#allocation2 + $0x2f]] }
  0x36   :  { %v441_v53 = vpop.eup %440  ;;  %v149_v54 = vmul.f32 %v439_v48, %v148_v30  ;;  %v166_v56 = vmul.f32 %v439_v48, %v165_v31  ;;  %v183_v57 = vmul.f32 %v439_v48, %v182_v32  ;;  %v174_v1 = vstv %s643_s6  ;;  %s701_s21 = sld [smem:[#allocation2 + $0x30]]  ;;  %s704_s22 = sld [smem:[#allocation2 + $0x31]] }
  0x37   :  { %v681_v58 = vpop.eup %442  ;;  %v147_v59 = vadd.f32 %v146_v49, %v144_v44  ;;  %v152_v60 = vmul.f32 %v441_v53, %v151_v34  ;;  %v164_v61 = vadd.f32 %v163_v50, %v161_v45  ;;  %v169_v62 = vmul.f32 %v441_v53, %v168_v35  ;;  %s706_s23 = sld [smem:[#allocation2 + $0x32]]  ;;  %s710_s24 = sld [smem:[#allocation2 + $0x33]] }
  0x38   :  { %v155_v63 = vmul.f32 %v681_v58, %v154_v39  ;;  %v181_v2 = vadd.f32 %v180_v51, %v178_v47  ;;  %v186_v3 = vmul.f32 %v441_v53, %v185_v40  ;;  %v172_v6 = vmul.f32 %v681_v58, %v171_v46  ;;  %s712_s26 = sld [smem:[#allocation2 + $0x34]]  ;;  %s715_s27 = sld [smem:[#allocation2 + $0x37]] }
  0x39   :  { %v150_v4 = vadd.f32 %v149_v54, %v147_v59  ;;  %v167_v5 = vadd.f32 %v166_v56, %v164_v61  ;;  %v189_v7 = vmul.f32 %v681_v58, %v188_v52  ;;  %v195_v9 = vmul.f32 %v657_v38, %v194_v25  ;;  %s717_s28 = sld [smem:[#allocation2 + $0x3c]]  ;;  %s724_s0 = sld [smem:[#allocation2 + $0x38]] }
  0x3a   :  { %v184_v8 = vadd.f32 %v183_v57, %v181_v2  ;;  %v197_v10 = vmul.f32 %v437_v43, %v196_v28  ;;  %v200_v11 = vmul.f32 %v439_v48, %v199_v36  ;;  %v191_v14 = vstv %s661_s8  ;;  %s726_s30 = sld [smem:[#allocation2 + $0x41]]  ;;  %s732_s3 = sld [smem:[#allocation2 + $0x3d]] }
  0x3b   :  { %v153_v12 = vadd.f32 %v152_v60, %v150_v4  ;;  %v170_v13 = vadd.f32 %v169_v62, %v167_v5  ;;  %v205_v15 = vstv %s659_s7  ;;  %v203_v18 = vmul.f32 %v441_v53, %v202_v41  ;;  %s734_s4 = sld [smem:[#allocation2 + $0x42]]  ;;  %s737_s15 = sld [smem:[#allocation2 + $0x35]] }
  0x3c   :  { %v187_v16 = vadd.f32 %v186_v3, %v184_v8  ;;  %v198_v17 = vadd.f32 %v197_v10, %v195_v9  ;;  %v206_v19 = vmul.f32 %v681_v58, %v205_v15  ;;  %v212_v22 = vmul.f32 %v657_v38, %v211_v29  ;;  %s739_s20 = sld [smem:[#allocation2 + $0x39]]  ;;  %s741_s25 = sld [smem:[#allocation2 + $0x3e]] }
  0x3d   :  { %v156_v20 = vadd.f32 %v155_v63, %v153_v12  ;;  %v173_v21 = vadd.f32 %v172_v6, %v170_v13  ;;  %v214_v23 = vmul.f32 %v437_v43, %v213_v33  ;;  %v217_v26 = vmul.f32 %v439_v48, %v216_v37  ;;  %s743_s29 = sld [smem:[#allocation2 + $0x43]]  ;;  %s747_s5 = sld [smem:[#allocation2 + $0x3a]] }
  0x3e   :  { %v190_v24 = vadd.f32 %v189_v7, %v187_v16  ;;  %v201_v25 = vadd.f32 %v200_v11, %v198_v17  ;;  %v220_v27 = vmul.f32 %v441_v53, %v219_v42  ;;  %v222_v31 = vstv %s671_s9  ;;  %s749_s6 = sld [smem:[#allocation2 + $0x3f]]  ;;  %s751_s7 = sld [smem:[#allocation2 + $0x36]] }
  0x3f   :  { %v158_v28 = vadd.f32 %v157_v55, %v156_v20  ;;  %v175_v30 = vadd.f32 %v174_v1, %v173_v21  ;;  %v215_v29 = vadd.f32 %v214_v23, %v212_v22  ;;  %v208_v34 = vstv %s673_s10  ;;  %s753_s8 = sld [smem:[#allocation2 + $0x3b]]  ;;  %s768_s9 = sld [smem:[#allocation2 + $0x40]] }
  0x40   :  { %v192_v32 = vadd.f32 %v191_v14, %v190_v24  ;;  %v204_v33 = vadd.f32 %v203_v18, %v201_v25  ;;  %v223_v36 = vmul.f32 %v681_v58, %v222_v31  ;;  %v225_v39 = vstv %s676_s11  ;;  %s781_s10 = sld [smem:[#allocation2 + $0x4c]] }
  0x41   :  { %444 = vtanh.f32 %v158_v28  ;;  %v218_v35 = vadd.f32 %v217_v26, %v215_v29  ;;  %v228_v41 = vstv %s678_s1  ;;  %v230_v42 = vstv %s693_s17  ;;  %s787_s11 = sld [smem:[#allocation2 + $0x44]]  ;;  %s789_s1 = sld [smem:[#allocation2 + $0x45]] }
  0x42   :  { %446 = vtanh.f32 %v175_v30  ;;  %v207_v37 = vadd.f32 %v206_v19, %v204_v33  ;;  %v233_v43 = vstv %s706_s23  ;;  %v236_v45 = vstv %s715_s27  ;;  %s425_s17 = sld [smem:[#allocation2 + $0x49]] }
  0x43   :  { %448 = vtanh.f32 %v192_v32  ;;  %v221_v38 = vadd.f32 %v220_v27, %v218_v35  ;;  %v239_v46 = vstv %s717_s28  ;;  %v245_v47 = vstv %s683_s12 }
  0x44   :  { %v209_v40 = vadd.f32 %v208_v34, %v207_v37  ;;  %v242_v48 = vstv %s726_s30  ;;  %v247_v49 = vstv %s695_s18  ;;  %v250_v50 = vstv %s710_s24  ;;  %s804_s18 = sld [smem:[#allocation2 + $0x4d]] }
  0x45   :  { %v224_v44 = vadd.f32 %v223_v36, %v221_v38  ;;  %v253_v52 = vstv %s724_s0  ;;  %v256_v53 = vstv %s732_s3  ;;  %v259_v54 = vstv %s734_s4 }
  0x46   :  { %450 = vtanh.f32 %v209_v40  ;;  %v262_v55 = vstv %s685_s13  ;;  %v264_v56 = vstv %s699_s19  ;;  %v267_v57 = vstv %s712_s26  ;;  %s114_s12 = ssub.f32 0.0, %s781_s10  ;;  %s422_s13 = sld [smem:[#allocation2 + $0x46]] }
  0x47   :  { %v226_v51 = vadd.f32 %v225_v39, %v224_v44  ;;  %v270_v58 = vstv %s739_s20  ;;  %v273_v59 = vstv %s741_s25  ;;  %v276_v60 = vstv %s743_s29  ;;  %s430_s19 = sld [smem:[#allocation2 + $0x4e]]  ;;  %s528_s26 = smov [#allocation7]  }
  0x48   :  { %v279_v61 = vstv %s687_s14  ;;  %v281_v62 = vstv %s701_s21  ;;  %v284_v63 = vstv %s737_s15  ;;  %v287_v1 = vstv %s747_s5  ;;  %s423_s14 = sld [smem:[#allocation2 + $0x47]]  ;;  %s426_s21 = sld [smem:[#allocation2 + $0x4a]] }
  0x49   :  { %452 = vtanh.f32 %v226_v51  ;;  %v290_v2 = vstv %s749_s6  ;;  %v296_v4 = vstv %s689_s16  ;;  %v298_v5 = vstv %s704_s22  ;;  %s424_s16 = sld [smem:[#allocation2 + $0x48]]  ;;  %s427_s22 = sld [smem:[#allocation2 + $0x4b]] }
  0x4a   :  { %v301_v6 = vstv %s751_s7  ;;  %v304_v7 = vstv %s753_s8  ;;  %v307_v29 = vstv %s768_s9  ;;  %s343_s27 = sshll.u32 %s528_s26, 4  ;;  %s344_s27 = int_to_ptr.vmem [resolvable:$true] %s343_s27 }
  0x4b   :  { %v445_v3 = vpop.eup %444  ;;  %s498_s28 = scalar_lea.vmem %s344_s27, 128  ;;  %p503_p12 = scmp.lt.s32.totalorder %s344_s27, %s344_s27 }
  0x4c   :  { %v447_v8 = vpop.eup %446  ;;  %v229_v9 = vmul.f32 %v445_v3, %v228_v41  ;;  %v246_v10 = vmul.f32 %v445_v3, %v245_v47  ;;  %v263_v11 = vmul.f32 %v445_v3, %v262_v55  ;;  %v280_v12 = vmul.f32 %v445_v3, %v279_v61  ;;  %p499_p11 = scmp.ne.s32.totalorder %s344_s27, %s498_s28  ;;  %p504_p13 = scmp.lt.s32.totalorder %s498_s28, %s498_s28 }
  0x4d   :  { %v449_v13 = vpop.eup %448  ;;  %v231_v14 = vmul.f32 %v447_v8, %v230_v42  ;;  %v248_v15 = vmul.f32 %v447_v8, %v247_v49  ;;  %v265_v16 = vmul.f32 %v447_v8, %v264_v56  ;;  %v282_v17 = vmul.f32 %v447_v8, %v281_v62  ;;  %s116_s23 = ssub.f32 %s430_s19, %s804_s18 }
  0x4e   :  { %v234_v18 = vmul.f32 %v449_v13, %v233_v43  ;;  %v251_v19 = vmul.f32 %v449_v13, %v250_v50  ;;  %v268_v20 = vmul.f32 %v449_v13, %v267_v57  ;;  %v285_v21 = vmul.f32 %v449_v13, %v284_v63  ;;  %p505_p0 = por %p504_p13, %p503_p12 }
  0x4f   :  { %v232_v22 = vadd.f32 %v231_v14, %v229_v9  ;;  %v249_v23 = vadd.f32 %v248_v15, %v246_v10  ;;  %v266_v24 = vadd.f32 %v265_v16, %v263_v11  ;;  %v283_v25 = vadd.f32 %v282_v17, %v280_v12  ;;  %s112_s24 = sadd.f32 %s804_s18, %s427_s22 }
  0x50   :  { %v451_v26 = vpop.eup %450  ;;  %v297_v27 = vmul.f32 %v445_v3, %v296_v4  ;;  %v299_v28 = vmul.f32 %v447_v8, %v298_v5  ;;  %v302_v30 = vmul.f32 %v449_v13, %v301_v6  ;;  %v293_v61 = vstv %s787_s11  ;;  %p506_p1 = pnand %p505_p0, %p499_p11 }
  0x51   :  { %v235_v31 = vadd.f32 %v234_v18, %v232_v22  ;;  %v237_v32 = vmul.f32 %v451_v26, %v236_v45  ;;  %v252_v33 = vadd.f32 %v251_v19, %v249_v23  ;;  %v254_v34 = vmul.f32 %v451_v26, %v253_v52 }
  0x52   :  { %v269_v35 = vadd.f32 %v268_v20, %v266_v24  ;;  %v271_v36 = vmul.f32 %v451_v26, %v270_v58  ;;  %v286_v37 = vadd.f32 %v285_v21, %v283_v25  ;;  %v288_v38 = vmul.f32 %v451_v26, %v287_v1 }
  0x53   :  { %v453_v39 = vpop.eup %452  ;;  %v238_v40 = vadd.f32 %v237_v32, %v235_v31  ;;  %v255_v41 = vadd.f32 %v254_v34, %v252_v33  ;;  %v300_v42 = vadd.f32 %v299_v28, %v297_v27  ;;  %v305_v43 = vmul.f32 %v451_v26, %v304_v7 }
  0x54   :  { %v240_v44 = vmul.f32 %v453_v39, %v239_v46  ;;  %v257_v47 = vmul.f32 %v453_v39, %v256_v53  ;;  %v272_v45 = vadd.f32 %v271_v36, %v269_v35  ;;  %v274_v49 = vmul.f32 %v453_v39, %v273_v59 }
  0x55   :  { %v289_v50 = vadd.f32 %v288_v38, %v286_v37  ;;  %v291_v51 = vmul.f32 %v453_v39, %v290_v2  ;;  %v303_v52 = vadd.f32 %v302_v30, %v300_v42  ;;  %v308_v55 = vmul.f32 %v453_v39, %v307_v29 }
  0x56   :  { %v241_v56 = vadd.f32 %v240_v44, %v238_v40  ;;  %v258_v57 = vadd.f32 %v257_v47, %v255_v41  ;;  %v275_v58 = vadd.f32 %v274_v49, %v272_v45  ;;  %v310_v1 = vstv %s789_s1 }
  0x57   :  { %v292_v62 = vadd.f32 %v291_v51, %v289_v50  ;;  %v306_v63 = vadd.f32 %v305_v43, %v303_v52  ;;  %v327_v3 = vstv %s114_s12  ;;  %v321_v10 = vstv %s425_s17 }
  0x58   :  { %v243_v46 = vadd.f32 %v242_v48, %v241_v56  ;;  %v260_v53 = vadd.f32 %v259_v54, %v258_v57  ;;  %v277_v4 = vadd.f32 %v276_v60, %v275_v58  ;;  %v328_v59 = vmul.f32 %v327_v3, %v578_v0 }
  0x59   :  { %v294_v5 = vadd.f32 %v293_v61, %v292_v62  ;;  %v309_v2 = vadd.f32 %v308_v55, %v306_v63  ;;  %v313_v0 = vstv %s422_s13  ;;  %v315_v48 = vstv %s423_s14 }
  0x5a   :  { %454 = vtanh.f32 %v243_v46  ;;  %v329_v7 = vmul.f32 1.442695, %v328_v59  ;;  %v318_v60 = vstv %s424_s16  ;;  %v324_v15 = vstv %s426_s21 }
  0x5b   :  { %456 = vtanh.f32 %v260_v53  ;;  %v311_v6 = vadd.f32 %v310_v1, %v309_v2  ;;  %v331_v20 = vstv %s116_s23  ;;  %v334_v26 = vstv %s112_s24 }
  0x5c   :  { %458 = vtanh.f32 %v277_v4 }
  0x5d   :  { %460 = vtanh.f32 %v294_v5 }
  0x5e   :  { %462 = vtanh.f32 %v311_v6 }
  0x5f   :  { %464 = vpow2.f32 %v329_v7 }
  0x64   :  { %v455_v54 = vpop.eup %454 }
  0x65   :  { %v457_v8 = vpop.eup %456  ;;  %v314_v9 = vmul.f32 %v455_v54, %v313_v0 }
  0x66   :  { %v459_v11 = vpop.eup %458  ;;  %v316_v12 = vmul.f32 %v457_v8, %v315_v48 }
  0x67   :  { %v461_v13 = vpop.eup %460  ;;  %v319_v14 = vmul.f32 %v459_v11, %v318_v60 }
  0x68   :  { %v463_v16 = vpop.eup %462  ;;  %v317_v17 = vadd.f32 %v316_v12, %v314_v9  ;;  %v322_v18 = vmul.f32 %v461_v13, %v321_v10 }
  0x69   :  { %v465_v19 = vpop.eup %464  ;;  %v325_v22 = vmul.f32 %v463_v16, %v324_v15 }
  0x6a   :  { %v320_v21 = vadd.f32 %v319_v14, %v317_v17  ;;  %v332_v24 = vmul.f32 %v465_v19, %v331_v20 }
  0x6c   :  { %v323_v23 = vadd.f32 %v322_v18, %v320_v21 }
  0x6e   :  { %v326_v25 = vadd.f32 %v325_v22, %v323_v23 }
  0x70   :  { %v333_v27 = vadd.f32 %v332_v24, %v326_v25 }
  0x72   :  { %v335_v28 = vadd.f32 %v334_v26, %v333_v27 }
  0x74   :  { %336 = vst [vmem:[#allocation7] sm:$0xff] %v335_v28 }
  0x75   :  { %509 = shalt.err (!%p506_p1)
}
  0x76   :  { %s510_s3 = scalar_lea.hbm %s822_s2, 128 }
  0x77   :  { %p511_p2 = scmp.ne.s32.totalorder %s822_s2, %s510_s3  ;;  %p514_p3 = scmp.lt.u32.totalorder %s510_s3, %s822_s2 }
  0x79   :  { %p516_p4 = pnand %p514_p3, %p511_p2 }
  0x7b   :  { %519 = shalt.err (!%p516_p4)
}
  0x7c   :  { %346 = dma.vmem_to_hbm [thread:$0]  %s344_s27, 128, %s822_s2, [#allocation4]  }
  0x7d   :  { %524 = dma.done.wait [#allocation4], 128  }
  0x7e   :  { %525 = vsyncadd [#allocation4], 4294967168 }
  0x7f   :  { %350 = vsyncpa [#allocation3], 1 }
  0x80   :  { %351 = vsyncpa [#allocation4], 1 }
  0x81   :  { %352 = vsyncpa [#allocation5], 1 }

</bundles_post_ra>
